<compile_context>
chip_gen: v7x
topology: tpu7x:2x2x1
jax: 0.10.0
libtpu: 0.0.40
codegen_flags: <defaults>
</compile_context>

<pallas_src>
import numpy as np
import jax
import jax.numpy as jnp
from jax import lax
from jax.experimental import pallas as pl
from jax.experimental.pallas import tpu as pltpu  # noqa: F401  (TPU backend)

NEG_INF = -1e30          # Python float: becomes a scalar literal, NOT a captured const
LRELU_ATT = 0.2          # GATConv attention leaky_relu slope
LRELU_OUT = 0.01         # F.leaky_relu default slope
GN_EPS = 1e-5


# ----------------------------------------------------------------------------
# Fused Pallas kernel: whole residual block in one call
# ----------------------------------------------------------------------------
def gat_resnet_block_kernel(
        x_ref, adj_ref, eattr_ref,
        w1_ref, as1_ref, ad1_ref, ae1_ref, we1_ref, b1_ref,
        w2_ref, as2_ref, ad2_ref, ae2_ref, we2_ref, b2_ref,
        gnw_ref, gnb_ref, gnm_ref,
        out_ref):
    x = x_ref[...]                            # [N, C]
    adj = adj_ref[...]                        # [N_tgt, N_src]
    n_edge_feats = eattr_ref.shape[0]         # E (static)

    def edge_logits(we, att_e):
        # logit_e[t, s] = sum_e eattr[e, t, s] * v[e],  v[e] = sum_c we[e,c] * att_e[c]
        v = jnp.sum(we * att_e, axis=1, keepdims=True)              # [E, 1]
        acc = eattr_ref[0] * v[0:1, :]
        for e in range(1, n_edge_feats):                            # static, fully unrolled (E small)
            acc = acc + eattr_ref[e] * v[e:e + 1, :]
        return acc                                                  # [N_tgt, N_src]

    def gat_layer(h, w_ref, as_ref, ad_ref, ae_ref, we_ref, b_ref):
        g = jnp.dot(h, w_ref[...], preferred_element_type=jnp.float32)        # [N, C]  (MXU)
        # target (dst) term -> column; source term -> row (sources on lanes)
        d_col = jnp.sum(g * ad_ref[...], axis=1, keepdims=True)               # [N, 1]
        s_row = lax.dot_general(as_ref[...], g, (((1,), (1,)), ((), ())),
                                preferred_element_type=jnp.float32)           # [1, N]
        logits = d_col + s_row + edge_logits(we_ref[...], ae_ref[...])        # [N_tgt, N_src]
        logits = jnp.where(logits > 0, logits, LRELU_ATT * logits)            # leaky_relu(0.2)
        logits = jnp.where(adj > 0, logits, NEG_INF)                          # mask non-edges
        logits = logits - jnp.max(logits, axis=1, keepdims=True)
        p = jnp.exp(logits) * adj
        alpha = p / jnp.sum(p, axis=1, keepdims=True)                         # softmax over sources
        return jnp.dot(alpha, g, preferred_element_type=jnp.float32) + b_ref[...]   # [N, C] (MXU)

    def graph_norm(h):
        # GraphNorm with batch=None (as called in the module): stats over all nodes.
        mean = jnp.mean(h, axis=0, keepdims=True)                             # [1, C]
        cent = h - mean * gnm_ref[...]
        var = jnp.mean(cent * cent, axis=0, keepdims=True)                    # [1, C]
        return cent * (gnw_ref[...] * lax.rsqrt(var + GN_EPS)) + gnb_ref[...]

    h = gat_layer(x, w1_ref, as1_ref, ad1_ref, ae1_ref, we1_ref, b1_ref)
    h = graph_norm(h)
    h = jnp.where(h > 0, h, LRELU_OUT * h)
    h = gat_layer(h, w2_ref, as2_ref, ad2_ref, ae2_ref, we2_ref, b2_ref)
    h = graph_norm(h) + x                                                     # residual
    out_ref[...] = jnp.where(h > 0, h, LRELU_OUT * h)


# ----------------------------------------------------------------------------
# Wrapper
# ----------------------------------------------------------------------------
def gat_resnet_block(x, adj, eattr_ets, params):
    """x: [N,C] f32, adj: [N,N] f32 mask, eattr_ets: [E,N,N] f32."""
    n, c = x.shape
    p1, p2 = params['gat1'], params['gat2']
    args = (x, adj, eattr_ets,
            p1['w'], p1['att_src'], p1['att_dst'], p1['att_edge'], p1['we'], p1['bias'],
            p2['w'], p2['att_src'], p2['att_dst'], p2['att_edge'], p2['we'], p2['bias'],
            params['gn_weight'], params['gn_bias'], params['gn_mean_scale'])
    # Whole working set is a few tens of KiB -> single grid-less call, whole-array
    # VMEM blocks (default BlockSpecs).  For large N, add a target-row grid axis
    # marked "parallel" and tile adj/eattr along targets.
    return pl.pallas_call(
        gat_resnet_block_kernel,
        out_shape=jax.ShapeDtypeStruct((n, c), jnp.float32),
    )(*args)


# ----------------------------------------------------------------------------
# Deterministic parameter init (shapes per GATConv(heads=1, concat=True) + GraphNorm)
# ----------------------------------------------------------------------------
def init_params(key, c, e):
    def gat_params(k):
        ks = jax.random.split(k, 6)
        lim = 1.0 / np.sqrt(c)
        lime = 1.0 / np.sqrt(e)
        return dict(
            w=jax.random.uniform(ks[0], (c, c), jnp.float32, -lim, lim),
            att_src=jax.random.uniform(ks[1], (1, c), jnp.float32, -lim, lim),
            att_dst=jax.random.uniform(ks[2], (1, c), jnp.float32, -lim, lim),
            att_edge=jax.random.uniform(ks[3], (1, c), jnp.float32, -lim, lim),
            we=jax.random.uniform(ks[4], (e, c), jnp.float32, -lime, lime),
            bias=jax.random.uniform(ks[5], (1, c), jnp.float32, -lim, lim),
        )
    k1, k2, k3, k4, k5 = jax.random.split(key, 5)
    return dict(
        gat1=gat_params(k1),
        gat2=gat_params(k2),
        # single shared GraphNorm instance (weight/bias/mean_scale); randomized to
        # exercise the math (default torch init is 1 / 0 / 1).
        gn_weight=jax.random.uniform(k3, (1, c), jnp.float32, 0.5, 1.5),
        gn_bias=0.1 * jax.random.normal(k4, (1, c), jnp.float32),
        gn_mean_scale=jax.random.uniform(k5, (1, c), jnp.float32, 0.5, 1.5),
    )


# ----------------------------------------------------------------------------
# Pure-JAX reference (same math, dense formulation) for a sanity check
# ----------------------------------------------------------------------------
def ref_forward(x, adj, eattr_tse, params):
    def gat(h, p):
        g = h @ p['w']
        d_col = jnp.sum(g * p['att_dst'], axis=1, keepdims=True)            # [N,1]
        s_row = jnp.einsum('oc,sc->os', p['att_src'], g)                    # [1,N]
        v = jnp.sum(p['we'] * p['att_edge'], axis=1)                        # [E]
        e_logit = jnp.einsum('tse,e->ts', eattr_tse, v)                     # [N,N]
        logits = d_col + s_row + e_logit
        logits = jnp.where(logits > 0, logits, LRELU_ATT * logits)
        logits = jnp.where(adj > 0, logits, NEG_INF)
        logits = logits - jnp.max(logits, axis=1, keepdims=True)
        pm = jnp.exp(logits) * adj
        alpha = pm / jnp.sum(pm, axis=1, keepdims=True)
        return alpha @ g + p['bias']

    def gnorm(h):
        mean = jnp.mean(h, axis=0, keepdims=True)
        cent = h - mean * params['gn_mean_scale']
        var = jnp.mean(cent * cent, axis=0, keepdims=True)
        return cent * (params['gn_weight'] * lax.rsqrt(var + GN_EPS)) + params['gn_bias']

    h = gat(x, params['gat1'])
    h = gnorm(h)
    h = jnp.where(h > 0, h, LRELU_OUT * h)
    h = gat(h, params['gat2'])
    h = gnorm(h) + x
    return jnp.where(h > 0, h, LRELU_OUT * h)


# ----------------------------------------------------------------------------
if __name__ == "__main__":
    N, C, E = 16, 64, 8                     # small synthetic molecular graph
    key = jax.random.PRNGKey(0)
    key, kx, ka, ke, kp = jax.random.split(key, 5)

    x = jax.random.normal(kx, (N, C), jnp.float32)

    eye = jnp.eye(N, dtype=bool)
    adj0 = (jax.random.uniform(ka, (N, N)) < 0.3) & (~eye)
    adj0 = adj0 | adj0.T                                         # undirected edges
    e_raw = jax.random.normal(ke, (N, N, E), jnp.float32)
    eattr = jnp.where(adj0[:, :, None], e_raw, 0.0)
    n_edges = jnp.maximum(jnp.sum(adj0), 1)
    mean_attr = jnp.sum(eattr, axis=(0, 1)) / n_edges            # fill_value='mean'
    eattr = jnp.where(eye[:, :, None], mean_attr[None, None, :], eattr)
    adj = (adj0 | eye).astype(jnp.float32)                       # add self-loops
    eattr_ets = jnp.transpose(eattr, (2, 0, 1))                  # [E, N_tgt, N_src] for kernel

    params = init_params(kp, C, E)

    out = gat_resnet_block(x, adj, eattr_ets, params)
    out = jax.block_until_ready(out)

    ref = jax.block_until_ready(ref_forward(x, adj, eattr, params))
    np.testing.assert_allclose(np.asarray(out), np.asarray(ref), rtol=2e-3, atol=2e-3)

    print("KERNEL_OK")
</pallas_src>

<mosaic_0001>
module attributes {stable_mosaic.version = 11 : i64} {
  func.func @gat_resnet_block_kernel(%arg0: memref<16x64xf32, #tpu.memory_space<vmem>>, %arg1: memref<16x16xf32, #tpu.memory_space<vmem>>, %arg2: memref<8x16x16xf32, #tpu.memory_space<vmem>>, %arg3: memref<64x64xf32, #tpu.memory_space<vmem>>, %arg4: memref<1x64xf32, #tpu.memory_space<vmem>>, %arg5: memref<1x64xf32, #tpu.memory_space<vmem>>, %arg6: memref<1x64xf32, #tpu.memory_space<vmem>>, %arg7: memref<8x64xf32, #tpu.memory_space<vmem>>, %arg8: memref<1x64xf32, #tpu.memory_space<vmem>>, %arg9: memref<64x64xf32, #tpu.memory_space<vmem>>, %arg10: memref<1x64xf32, #tpu.memory_space<vmem>>, %arg11: memref<1x64xf32, #tpu.memory_space<vmem>>, %arg12: memref<1x64xf32, #tpu.memory_space<vmem>>, %arg13: memref<8x64xf32, #tpu.memory_space<vmem>>, %arg14: memref<1x64xf32, #tpu.memory_space<vmem>>, %arg15: memref<1x64xf32, #tpu.memory_space<vmem>>, %arg16: memref<1x64xf32, #tpu.memory_space<vmem>>, %arg17: memref<1x64xf32, #tpu.memory_space<vmem>>, %arg18: memref<16x64xf32, #tpu.memory_space<vmem>>) attributes {dimension_semantics = [], scalar_prefetch = 0 : i64, scratch_operands = 0 : i64, tpu.core_type = #tpu.core_type<tc>} {
    %c0 = arith.constant 0 : index
    %c0_0 = arith.constant 0 : index
    %0 = vector.load %arg0[%c0, %c0_0] : memref<16x64xf32, #tpu.memory_space<vmem>>, vector<16x64xf32>
    %c0_1 = arith.constant 0 : index
    %c0_2 = arith.constant 0 : index
    %1 = vector.load %arg1[%c0_1, %c0_2] : memref<16x16xf32, #tpu.memory_space<vmem>>, vector<16x16xf32>
    %c0_3 = arith.constant 0 : index
    %c0_4 = arith.constant 0 : index
    %2 = vector.load %arg3[%c0_3, %c0_4] : memref<64x64xf32, #tpu.memory_space<vmem>>, vector<64x64xf32>
    %cst = arith.constant dense<0.000000e+00> : vector<16x64xf32>
    %3 = tpu.matmul %0, %2, %cst {dimension_numbers = #tpu.dot_dimension_numbers<[1], [0], [0], [1], [0, 0, 1, 1], [], []>} : vector<16x64xf32>, vector<64x64xf32>, vector<16x64xf32> -> vector<16x64xf32>
    %c0_5 = arith.constant 0 : index
    %c0_6 = arith.constant 0 : index
    %4 = vector.load %arg5[%c0_5, %c0_6] : memref<1x64xf32, #tpu.memory_space<vmem>>, vector<1x64xf32>
    %5 = vector.broadcast %4 : vector<1x64xf32> to vector<16x64xf32>
    %6 = arith.mulf %3, %5 : vector<16x64xf32>
    %cst_7 = arith.constant dense<0.000000e+00> : vector<16xf32>
    %7 = vector.multi_reduction <add>, %6, %cst_7 [1] : vector<16x64xf32> to vector<16xf32>
    %8 = vector.shape_cast %7 : vector<16xf32> to vector<16x1xf32>
    %c0_8 = arith.constant 0 : index
    %c0_9 = arith.constant 0 : index
    %9 = vector.load %arg4[%c0_8, %c0_9] : memref<1x64xf32, #tpu.memory_space<vmem>>, vector<1x64xf32>
    %cst_10 = arith.constant dense<0.000000e+00> : vector<1x16xf32>
    %10 = tpu.matmul %9, %3, %cst_10 {dimension_numbers = #tpu.dot_dimension_numbers<[1], [1], [0], [0], [0, 0, 1, 0], [], []>} : vector<1x64xf32>, vector<16x64xf32>, vector<1x16xf32> -> vector<1x16xf32>
    %11 = vector.broadcast %8 : vector<16x1xf32> to vector<16x16xf32>
    %12 = vector.broadcast %10 : vector<1x16xf32> to vector<16x16xf32>
    %13 = arith.addf %11, %12 : vector<16x16xf32>
    %c0_11 = arith.constant 0 : index
    %c0_12 = arith.constant 0 : index
    %14 = vector.load %arg7[%c0_11, %c0_12] : memref<8x64xf32, #tpu.memory_space<vmem>>, vector<8x64xf32>
    %c0_13 = arith.constant 0 : index
    %c0_14 = arith.constant 0 : index
    %15 = vector.load %arg6[%c0_13, %c0_14] : memref<1x64xf32, #tpu.memory_space<vmem>>, vector<1x64xf32>
    %16 = vector.broadcast %15 : vector<1x64xf32> to vector<8x64xf32>
    %17 = arith.mulf %14, %16 : vector<8x64xf32>
    %cst_15 = arith.constant dense<0.000000e+00> : vector<8xf32>
    %18 = vector.multi_reduction <add>, %17, %cst_15 [1] : vector<8x64xf32> to vector<8xf32>
    %19 = vector.shape_cast %18 : vector<8xf32> to vector<8x1xf32>
    %c0_16 = arith.constant 0 : index
    %c0_17 = arith.constant 0 : index
    %c0_18 = arith.constant 0 : index
    %20 = vector.load %arg2[%c0_16, %c0_17, %c0_18] : memref<8x16x16xf32, #tpu.memory_space<vmem>>, vector<1x16x16xf32>
    %21 = vector.shape_cast %20 : vector<1x16x16xf32> to vector<16x16xf32>
    %22 = vector.extract_strided_slice %19 {offsets = [0, 0], sizes = [1, 1], strides = [1, 1]} : vector<8x1xf32> to vector<1x1xf32>
    %23 = vector.broadcast %22 : vector<1x1xf32> to vector<16x16xf32>
    %24 = arith.mulf %21, %23 : vector<16x16xf32>
    %c1 = arith.constant 1 : index
    %c0_19 = arith.constant 0 : index
    %c0_20 = arith.constant 0 : index
    %25 = vector.load %arg2[%c1, %c0_19, %c0_20] : memref<8x16x16xf32, #tpu.memory_space<vmem>>, vector<1x16x16xf32>
    %26 = vector.shape_cast %25 : vector<1x16x16xf32> to vector<16x16xf32>
    %27 = vector.extract_strided_slice %19 {offsets = [1, 0], sizes = [1, 1], strides = [1, 1]} : vector<8x1xf32> to vector<1x1xf32>
    %28 = vector.broadcast %27 : vector<1x1xf32> to vector<16x16xf32>
    %29 = arith.mulf %26, %28 : vector<16x16xf32>
    %30 = arith.addf %24, %29 : vector<16x16xf32>
    %c2 = arith.constant 2 : index
    %c0_21 = arith.constant 0 : index
    %c0_22 = arith.constant 0 : index
    %31 = vector.load %arg2[%c2, %c0_21, %c0_22] : memref<8x16x16xf32, #tpu.memory_space<vmem>>, vector<1x16x16xf32>
    %32 = vector.shape_cast %31 : vector<1x16x16xf32> to vector<16x16xf32>
    %33 = vector.extract_strided_slice %19 {offsets = [2, 0], sizes = [1, 1], strides = [1, 1]} : vector<8x1xf32> to vector<1x1xf32>
    %34 = vector.broadcast %33 : vector<1x1xf32> to vector<16x16xf32>
    %35 = arith.mulf %32, %34 : vector<16x16xf32>
    %36 = arith.addf %30, %35 : vector<16x16xf32>
    %c3 = arith.constant 3 : index
    %c0_23 = arith.constant 0 : index
    %c0_24 = arith.constant 0 : index
    %37 = vector.load %arg2[%c3, %c0_23, %c0_24] : memref<8x16x16xf32, #tpu.memory_space<vmem>>, vector<1x16x16xf32>
    %38 = vector.shape_cast %37 : vector<1x16x16xf32> to vector<16x16xf32>
    %39 = vector.extract_strided_slice %19 {offsets = [3, 0], sizes = [1, 1], strides = [1, 1]} : vector<8x1xf32> to vector<1x1xf32>
    %40 = vector.broadcast %39 : vector<1x1xf32> to vector<16x16xf32>
    %41 = arith.mulf %38, %40 : vector<16x16xf32>
    %42 = arith.addf %36, %41 : vector<16x16xf32>
    %c4 = arith.constant 4 : index
    %c0_25 = arith.constant 0 : index
    %c0_26 = arith.constant 0 : index
    %43 = vector.load %arg2[%c4, %c0_25, %c0_26] : memref<8x16x16xf32, #tpu.memory_space<vmem>>, vector<1x16x16xf32>
    %44 = vector.shape_cast %43 : vector<1x16x16xf32> to vector<16x16xf32>
    %45 = vector.extract_strided_slice %19 {offsets = [4, 0], sizes = [1, 1], strides = [1, 1]} : vector<8x1xf32> to vector<1x1xf32>
    %46 = vector.broadcast %45 : vector<1x1xf32> to vector<16x16xf32>
    %47 = arith.mulf %44, %46 : vector<16x16xf32>
    %48 = arith.addf %42, %47 : vector<16x16xf32>
    %c5 = arith.constant 5 : index
    %c0_27 = arith.constant 0 : index
    %c0_28 = arith.constant 0 : index
    %49 = vector.load %arg2[%c5, %c0_27, %c0_28] : memref<8x16x16xf32, #tpu.memory_space<vmem>>, vector<1x16x16xf32>
    %50 = vector.shape_cast %49 : vector<1x16x16xf32> to vector<16x16xf32>
    %51 = vector.extract_strided_slice %19 {offsets = [5, 0], sizes = [1, 1], strides = [1, 1]} : vector<8x1xf32> to vector<1x1xf32>
    %52 = vector.broadcast %51 : vector<1x1xf32> to vector<16x16xf32>
    %53 = arith.mulf %50, %52 : vector<16x16xf32>
    %54 = arith.addf %48, %53 : vector<16x16xf32>
    %c6 = arith.constant 6 : index
    %c0_29 = arith.constant 0 : index
    %c0_30 = arith.constant 0 : index
    %55 = vector.load %arg2[%c6, %c0_29, %c0_30] : memref<8x16x16xf32, #tpu.memory_space<vmem>>, vector<1x16x16xf32>
    %56 = vector.shape_cast %55 : vector<1x16x16xf32> to vector<16x16xf32>
    %57 = vector.extract_strided_slice %19 {offsets = [6, 0], sizes = [1, 1], strides = [1, 1]} : vector<8x1xf32> to vector<1x1xf32>
    %58 = vector.broadcast %57 : vector<1x1xf32> to vector<16x16xf32>
    %59 = arith.mulf %56, %58 : vector<16x16xf32>
    %60 = arith.addf %54, %59 : vector<16x16xf32>
    %c7 = arith.constant 7 : index
    %c0_31 = arith.constant 0 : index
    %c0_32 = arith.constant 0 : index
    %61 = vector.load %arg2[%c7, %c0_31, %c0_32] : memref<8x16x16xf32, #tpu.memory_space<vmem>>, vector<1x16x16xf32>
    %62 = vector.shape_cast %61 : vector<1x16x16xf32> to vector<16x16xf32>
    %63 = vector.extract_strided_slice %19 {offsets = [7, 0], sizes = [1, 1], strides = [1, 1]} : vector<8x1xf32> to vector<1x1xf32>
    %64 = vector.broadcast %63 : vector<1x1xf32> to vector<16x16xf32>
    %65 = arith.mulf %62, %64 : vector<16x16xf32>
    %66 = arith.addf %60, %65 : vector<16x16xf32>
    %67 = arith.addf %13, %66 : vector<16x16xf32>
    %cst_33 = arith.constant 0.000000e+00 : f32
    %68 = vector.broadcast %cst_33 : f32 to vector<16x16xf32>
    %69 = arith.cmpf ogt, %67, %68 : vector<16x16xf32>
    %cst_34 = arith.constant 2.000000e-01 : f32
    %70 = vector.broadcast %cst_34 : f32 to vector<16x16xf32>
    %71 = arith.mulf %70, %67 : vector<16x16xf32>
    %72 = arith.select %69, %67, %71 : vector<16x16xi1>, vector<16x16xf32>
    %cst_35 = arith.constant 0.000000e+00 : f32
    %73 = vector.broadcast %cst_35 : f32 to vector<16x16xf32>
    %74 = arith.cmpf ogt, %1, %73 : vector<16x16xf32>
    %cst_36 = arith.constant -1.000000e+30 : f32
    %75 = vector.broadcast %cst_36 : f32 to vector<16x16xf32>
    %76 = arith.select %74, %72, %75 : vector<16x16xi1>, vector<16x16xf32>
    %cst_37 = arith.constant dense<0xFF800000> : vector<16xf32>
    %77 = vector.multi_reduction <maximumf>, %76, %cst_37 [1] : vector<16x16xf32> to vector<16xf32>
    %78 = vector.shape_cast %77 : vector<16xf32> to vector<16x1xf32>
    %79 = vector.broadcast %78 : vector<16x1xf32> to vector<16x16xf32>
    %80 = arith.subf %76, %79 : vector<16x16xf32>
    %81 = math.exp %80 : vector<16x16xf32>
    %82 = arith.mulf %81, %1 : vector<16x16xf32>
    %cst_38 = arith.constant dense<0.000000e+00> : vector<16xf32>
    %83 = vector.multi_reduction <add>, %82, %cst_38 [1] : vector<16x16xf32> to vector<16xf32>
    %84 = vector.shape_cast %83 : vector<16xf32> to vector<16x1xf32>
    %85 = vector.broadcast %84 : vector<16x1xf32> to vector<16x16xf32>
    %86 = arith.divf %82, %85 : vector<16x16xf32>
    %cst_39 = arith.constant dense<0.000000e+00> : vector<16x64xf32>
    %87 = tpu.matmul %86, %3, %cst_39 {dimension_numbers = #tpu.dot_dimension_numbers<[1], [0], [0], [1], [0, 0, 1, 1], [], []>} : vector<16x16xf32>, vector<16x64xf32>, vector<16x64xf32> -> vector<16x64xf32>
    %c0_40 = arith.constant 0 : index
    %c0_41 = arith.constant 0 : index
    %88 = vector.load %arg8[%c0_40, %c0_41] : memref<1x64xf32, #tpu.memory_space<vmem>>, vector<1x64xf32>
    %89 = vector.broadcast %88 : vector<1x64xf32> to vector<16x64xf32>
    %90 = arith.addf %87, %89 : vector<16x64xf32>
    %cst_42 = arith.constant dense<0.000000e+00> : vector<64xf32>
    %91 = vector.multi_reduction <add>, %90, %cst_42 [0] : vector<16x64xf32> to vector<64xf32>
    %92 = vector.shape_cast %91 : vector<64xf32> to vector<1x64xf32>
    %cst_43 = arith.constant 1.600000e+01 : f32
    %93 = vector.broadcast %cst_43 : f32 to vector<1x64xf32>
    %94 = arith.divf %92, %93 : vector<1x64xf32>
    %c0_44 = arith.constant 0 : index
    %c0_45 = arith.constant 0 : index
    %95 = vector.load %arg17[%c0_44, %c0_45] : memref<1x64xf32, #tpu.memory_space<vmem>>, vector<1x64xf32>
    %96 = arith.mulf %94, %95 : vector<1x64xf32>
    %97 = vector.broadcast %96 : vector<1x64xf32> to vector<16x64xf32>
    %98 = arith.subf %90, %97 : vector<16x64xf32>
    %99 = arith.mulf %98, %98 : vector<16x64xf32>
    %cst_46 = arith.constant dense<0.000000e+00> : vector<64xf32>
    %100 = vector.multi_reduction <add>, %99, %cst_46 [0] : vector<16x64xf32> to vector<64xf32>
    %101 = vector.shape_cast %100 : vector<64xf32> to vector<1x64xf32>
    %cst_47 = arith.constant 1.600000e+01 : f32
    %102 = vector.broadcast %cst_47 : f32 to vector<1x64xf32>
    %103 = arith.divf %101, %102 : vector<1x64xf32>
    %c0_48 = arith.constant 0 : index
    %c0_49 = arith.constant 0 : index
    %104 = vector.load %arg15[%c0_48, %c0_49] : memref<1x64xf32, #tpu.memory_space<vmem>>, vector<1x64xf32>
    %cst_50 = arith.constant 9.99999974E-6 : f32
    %105 = vector.broadcast %cst_50 : f32 to vector<1x64xf32>
    %106 = arith.addf %103, %105 : vector<1x64xf32>
    %107 = math.rsqrt %106 : vector<1x64xf32>
    %108 = arith.mulf %104, %107 : vector<1x64xf32>
    %109 = vector.broadcast %108 : vector<1x64xf32> to vector<16x64xf32>
    %110 = arith.mulf %98, %109 : vector<16x64xf32>
    %c0_51 = arith.constant 0 : index
    %c0_52 = arith.constant 0 : index
    %111 = vector.load %arg16[%c0_51, %c0_52] : memref<1x64xf32, #tpu.memory_space<vmem>>, vector<1x64xf32>
    %112 = vector.broadcast %111 : vector<1x64xf32> to vector<16x64xf32>
    %113 = arith.addf %110, %112 : vector<16x64xf32>
    %cst_53 = arith.constant 0.000000e+00 : f32
    %114 = vector.broadcast %cst_53 : f32 to vector<16x64xf32>
    %115 = arith.cmpf ogt, %113, %114 : vector<16x64xf32>
    %cst_54 = arith.constant 0.00999999977 : f32
    %116 = vector.broadcast %cst_54 : f32 to vector<16x64xf32>
    %117 = arith.mulf %116, %113 : vector<16x64xf32>
    %118 = arith.select %115, %113, %117 : vector<16x64xi1>, vector<16x64xf32>
    %c0_55 = arith.constant 0 : index
    %c0_56 = arith.constant 0 : index
    %119 = vector.load %arg9[%c0_55, %c0_56] : memref<64x64xf32, #tpu.memory_space<vmem>>, vector<64x64xf32>
    %cst_57 = arith.constant dense<0.000000e+00> : vector<16x64xf32>
    %120 = tpu.matmul %118, %119, %cst_57 {dimension_numbers = #tpu.dot_dimension_numbers<[1], [0], [0], [1], [0, 0, 1, 1], [], []>} : vector<16x64xf32>, vector<64x64xf32>, vector<16x64xf32> -> vector<16x64xf32>
    %c0_58 = arith.constant 0 : index
    %c0_59 = arith.constant 0 : index
    %121 = vector.load %arg11[%c0_58, %c0_59] : memref<1x64xf32, #tpu.memory_space<vmem>>, vector<1x64xf32>
    %122 = vector.broadcast %121 : vector<1x64xf32> to vector<16x64xf32>
    %123 = arith.mulf %120, %122 : vector<16x64xf32>
    %cst_60 = arith.constant dense<0.000000e+00> : vector<16xf32>
    %124 = vector.multi_reduction <add>, %123, %cst_60 [1] : vector<16x64xf32> to vector<16xf32>
    %125 = vector.shape_cast %124 : vector<16xf32> to vector<16x1xf32>
    %c0_61 = arith.constant 0 : index
    %c0_62 = arith.constant 0 : index
    %126 = vector.load %arg10[%c0_61, %c0_62] : memref<1x64xf32, #tpu.memory_space<vmem>>, vector<1x64xf32>
    %cst_63 = arith.constant dense<0.000000e+00> : vector<1x16xf32>
    %127 = tpu.matmul %126, %120, %cst_63 {dimension_numbers = #tpu.dot_dimension_numbers<[1], [1], [0], [0], [0, 0, 1, 0], [], []>} : vector<1x64xf32>, vector<16x64xf32>, vector<1x16xf32> -> vector<1x16xf32>
    %128 = vector.broadcast %125 : vector<16x1xf32> to vector<16x16xf32>
    %129 = vector.broadcast %127 : vector<1x16xf32> to vector<16x16xf32>
    %130 = arith.addf %128, %129 : vector<16x16xf32>
    %c0_64 = arith.constant 0 : index
    %c0_65 = arith.constant 0 : index
    %131 = vector.load %arg13[%c0_64, %c0_65] : memref<8x64xf32, #tpu.memory_space<vmem>>, vector<8x64xf32>
    %c0_66 = arith.constant 0 : index
    %c0_67 = arith.constant 0 : index
    %132 = vector.load %arg12[%c0_66, %c0_67] : memref<1x64xf32, #tpu.memory_space<vmem>>, vector<1x64xf32>
    %133 = vector.broadcast %132 : vector<1x64xf32> to vector<8x64xf32>
    %134 = arith.mulf %131, %133 : vector<8x64xf32>
    %cst_68 = arith.constant dense<0.000000e+00> : vector<8xf32>
    %135 = vector.multi_reduction <add>, %134, %cst_68 [1] : vector<8x64xf32> to vector<8xf32>
    %136 = vector.shape_cast %135 : vector<8xf32> to vector<8x1xf32>
    %c0_69 = arith.constant 0 : index
    %c0_70 = arith.constant 0 : index
    %c0_71 = arith.constant 0 : index
    %137 = vector.load %arg2[%c0_69, %c0_70, %c0_71] : memref<8x16x16xf32, #tpu.memory_space<vmem>>, vector<1x16x16xf32>
    %138 = vector.shape_cast %137 : vector<1x16x16xf32> to vector<16x16xf32>
    %139 = vector.extract_strided_slice %136 {offsets = [0, 0], sizes = [1, 1], strides = [1, 1]} : vector<8x1xf32> to vector<1x1xf32>
    %140 = vector.broadcast %139 : vector<1x1xf32> to vector<16x16xf32>
    %141 = arith.mulf %138, %140 : vector<16x16xf32>
    %c1_72 = arith.constant 1 : index
    %c0_73 = arith.constant 0 : index
    %c0_74 = arith.constant 0 : index
    %142 = vector.load %arg2[%c1_72, %c0_73, %c0_74] : memref<8x16x16xf32, #tpu.memory_space<vmem>>, vector<1x16x16xf32>
    %143 = vector.shape_cast %142 : vector<1x16x16xf32> to vector<16x16xf32>
    %144 = vector.extract_strided_slice %136 {offsets = [1, 0], sizes = [1, 1], strides = [1, 1]} : vector<8x1xf32> to vector<1x1xf32>
    %145 = vector.broadcast %144 : vector<1x1xf32> to vector<16x16xf32>
    %146 = arith.mulf %143, %145 : vector<16x16xf32>
    %147 = arith.addf %141, %146 : vector<16x16xf32>
    %c2_75 = arith.constant 2 : index
    %c0_76 = arith.constant 0 : index
    %c0_77 = arith.constant 0 : index
    %148 = vector.load %arg2[%c2_75, %c0_76, %c0_77] : memref<8x16x16xf32, #tpu.memory_space<vmem>>, vector<1x16x16xf32>
    %149 = vector.shape_cast %148 : vector<1x16x16xf32> to vector<16x16xf32>
    %150 = vector.extract_strided_slice %136 {offsets = [2, 0], sizes = [1, 1], strides = [1, 1]} : vector<8x1xf32> to vector<1x1xf32>
    %151 = vector.broadcast %150 : vector<1x1xf32> to vector<16x16xf32>
    %152 = arith.mulf %149, %151 : vector<16x16xf32>
    %153 = arith.addf %147, %152 : vector<16x16xf32>
    %c3_78 = arith.constant 3 : index
    %c0_79 = arith.constant 0 : index
    %c0_80 = arith.constant 0 : index
    %154 = vector.load %arg2[%c3_78, %c0_79, %c0_80] : memref<8x16x16xf32, #tpu.memory_space<vmem>>, vector<1x16x16xf32>
    %155 = vector.shape_cast %154 : vector<1x16x16xf32> to vector<16x16xf32>
    %156 = vector.extract_strided_slice %136 {offsets = [3, 0], sizes = [1, 1], strides = [1, 1]} : vector<8x1xf32> to vector<1x1xf32>
    %157 = vector.broadcast %156 : vector<1x1xf32> to vector<16x16xf32>
    %158 = arith.mulf %155, %157 : vector<16x16xf32>
    %159 = arith.addf %153, %158 : vector<16x16xf32>
    %c4_81 = arith.constant 4 : index
    %c0_82 = arith.constant 0 : index
    %c0_83 = arith.constant 0 : index
    %160 = vector.load %arg2[%c4_81, %c0_82, %c0_83] : memref<8x16x16xf32, #tpu.memory_space<vmem>>, vector<1x16x16xf32>
    %161 = vector.shape_cast %160 : vector<1x16x16xf32> to vector<16x16xf32>
    %162 = vector.extract_strided_slice %136 {offsets = [4, 0], sizes = [1, 1], strides = [1, 1]} : vector<8x1xf32> to vector<1x1xf32>
    %163 = vector.broadcast %162 : vector<1x1xf32> to vector<16x16xf32>
    %164 = arith.mulf %161, %163 : vector<16x16xf32>
    %165 = arith.addf %159, %164 : vector<16x16xf32>
    %c5_84 = arith.constant 5 : index
    %c0_85 = arith.constant 0 : index
    %c0_86 = arith.constant 0 : index
    %166 = vector.load %arg2[%c5_84, %c0_85, %c0_86] : memref<8x16x16xf32, #tpu.memory_space<vmem>>, vector<1x16x16xf32>
    %167 = vector.shape_cast %166 : vector<1x16x16xf32> to vector<16x16xf32>
    %168 = vector.extract_strided_slice %136 {offsets = [5, 0], sizes = [1, 1], strides = [1, 1]} : vector<8x1xf32> to vector<1x1xf32>
    %169 = vector.broadcast %168 : vector<1x1xf32> to vector<16x16xf32>
    %170 = arith.mulf %167, %169 : vector<16x16xf32>
    %171 = arith.addf %165, %170 : vector<16x16xf32>
    %c6_87 = arith.constant 6 : index
    %c0_88 = arith.constant 0 : index
    %c0_89 = arith.constant 0 : index
    %172 = vector.load %arg2[%c6_87, %c0_88, %c0_89] : memref<8x16x16xf32, #tpu.memory_space<vmem>>, vector<1x16x16xf32>
    %173 = vector.shape_cast %172 : vector<1x16x16xf32> to vector<16x16xf32>
    %174 = vector.extract_strided_slice %136 {offsets = [6, 0], sizes = [1, 1], strides = [1, 1]} : vector<8x1xf32> to vector<1x1xf32>
    %175 = vector.broadcast %174 : vector<1x1xf32> to vector<16x16xf32>
    %176 = arith.mulf %173, %175 : vector<16x16xf32>
    %177 = arith.addf %171, %176 : vector<16x16xf32>
    %c7_90 = arith.constant 7 : index
    %c0_91 = arith.constant 0 : index
    %c0_92 = arith.constant 0 : index
    %178 = vector.load %arg2[%c7_90, %c0_91, %c0_92] : memref<8x16x16xf32, #tpu.memory_space<vmem>>, vector<1x16x16xf32>
    %179 = vector.shape_cast %178 : vector<1x16x16xf32> to vector<16x16xf32>
    %180 = vector.extract_strided_slice %136 {offsets = [7, 0], sizes = [1, 1], strides = [1, 1]} : vector<8x1xf32> to vector<1x1xf32>
    %181 = vector.broadcast %180 : vector<1x1xf32> to vector<16x16xf32>
    %182 = arith.mulf %179, %181 : vector<16x16xf32>
    %183 = arith.addf %177, %182 : vector<16x16xf32>
    %184 = arith.addf %130, %183 : vector<16x16xf32>
    %cst_93 = arith.constant 0.000000e+00 : f32
    %185 = vector.broadcast %cst_93 : f32 to vector<16x16xf32>
    %186 = arith.cmpf ogt, %184, %185 : vector<16x16xf32>
    %cst_94 = arith.constant 2.000000e-01 : f32
    %187 = vector.broadcast %cst_94 : f32 to vector<16x16xf32>
    %188 = arith.mulf %187, %184 : vector<16x16xf32>
    %189 = arith.select %186, %184, %188 : vector<16x16xi1>, vector<16x16xf32>
    %cst_95 = arith.constant 0.000000e+00 : f32
    %190 = vector.broadcast %cst_95 : f32 to vector<16x16xf32>
    %191 = arith.cmpf ogt, %1, %190 : vector<16x16xf32>
    %cst_96 = arith.constant -1.000000e+30 : f32
    %192 = vector.broadcast %cst_96 : f32 to vector<16x16xf32>
    %193 = arith.select %191, %189, %192 : vector<16x16xi1>, vector<16x16xf32>
    %cst_97 = arith.constant dense<0xFF800000> : vector<16xf32>
    %194 = vector.multi_reduction <maximumf>, %193, %cst_97 [1] : vector<16x16xf32> to vector<16xf32>
    %195 = vector.shape_cast %194 : vector<16xf32> to vector<16x1xf32>
    %196 = vector.broadcast %195 : vector<16x1xf32> to vector<16x16xf32>
    %197 = arith.subf %193, %196 : vector<16x16xf32>
    %198 = math.exp %197 : vector<16x16xf32>
    %199 = arith.mulf %198, %1 : vector<16x16xf32>
    %cst_98 = arith.constant dense<0.000000e+00> : vector<16xf32>
    %200 = vector.multi_reduction <add>, %199, %cst_98 [1] : vector<16x16xf32> to vector<16xf32>
    %201 = vector.shape_cast %200 : vector<16xf32> to vector<16x1xf32>
    %202 = vector.broadcast %201 : vector<16x1xf32> to vector<16x16xf32>
    %203 = arith.divf %199, %202 : vector<16x16xf32>
    %cst_99 = arith.constant dense<0.000000e+00> : vector<16x64xf32>
    %204 = tpu.matmul %203, %120, %cst_99 {dimension_numbers = #tpu.dot_dimension_numbers<[1], [0], [0], [1], [0, 0, 1, 1], [], []>} : vector<16x16xf32>, vector<16x64xf32>, vector<16x64xf32> -> vector<16x64xf32>
    %c0_100 = arith.constant 0 : index
    %c0_101 = arith.constant 0 : index
    %205 = vector.load %arg14[%c0_100, %c0_101] : memref<1x64xf32, #tpu.memory_space<vmem>>, vector<1x64xf32>
    %206 = vector.broadcast %205 : vector<1x64xf32> to vector<16x64xf32>
    %207 = arith.addf %204, %206 : vector<16x64xf32>
    %cst_102 = arith.constant dense<0.000000e+00> : vector<64xf32>
    %208 = vector.multi_reduction <add>, %207, %cst_102 [0] : vector<16x64xf32> to vector<64xf32>
    %209 = vector.shape_cast %208 : vector<64xf32> to vector<1x64xf32>
    %cst_103 = arith.constant 1.600000e+01 : f32
    %210 = vector.broadcast %cst_103 : f32 to vector<1x64xf32>
    %211 = arith.divf %209, %210 : vector<1x64xf32>
    %c0_104 = arith.constant 0 : index
    %c0_105 = arith.constant 0 : index
    %212 = vector.load %arg17[%c0_104, %c0_105] : memref<1x64xf32, #tpu.memory_space<vmem>>, vector<1x64xf32>
    %213 = arith.mulf %211, %212 : vector<1x64xf32>
    %214 = vector.broadcast %213 : vector<1x64xf32> to vector<16x64xf32>
    %215 = arith.subf %207, %214 : vector<16x64xf32>
    %216 = arith.mulf %215, %215 : vector<16x64xf32>
    %cst_106 = arith.constant dense<0.000000e+00> : vector<64xf32>
    %217 = vector.multi_reduction <add>, %216, %cst_106 [0] : vector<16x64xf32> to vector<64xf32>
    %218 = vector.shape_cast %217 : vector<64xf32> to vector<1x64xf32>
    %cst_107 = arith.constant 1.600000e+01 : f32
    %219 = vector.broadcast %cst_107 : f32 to vector<1x64xf32>
    %220 = arith.divf %218, %219 : vector<1x64xf32>
    %c0_108 = arith.constant 0 : index
    %c0_109 = arith.constant 0 : index
    %221 = vector.load %arg15[%c0_108, %c0_109] : memref<1x64xf32, #tpu.memory_space<vmem>>, vector<1x64xf32>
    %cst_110 = arith.constant 9.99999974E-6 : f32
    %222 = vector.broadcast %cst_110 : f32 to vector<1x64xf32>
    %223 = arith.addf %220, %222 : vector<1x64xf32>
    %224 = math.rsqrt %223 : vector<1x64xf32>
    %225 = arith.mulf %221, %224 : vector<1x64xf32>
    %226 = vector.broadcast %225 : vector<1x64xf32> to vector<16x64xf32>
    %227 = arith.mulf %215, %226 : vector<16x64xf32>
    %c0_111 = arith.constant 0 : index
    %c0_112 = arith.constant 0 : index
    %228 = vector.load %arg16[%c0_111, %c0_112] : memref<1x64xf32, #tpu.memory_space<vmem>>, vector<1x64xf32>
    %229 = vector.broadcast %228 : vector<1x64xf32> to vector<16x64xf32>
    %230 = arith.addf %227, %229 : vector<16x64xf32>
    %231 = arith.addf %230, %0 : vector<16x64xf32>
    %cst_113 = arith.constant 0.000000e+00 : f32
    %232 = vector.broadcast %cst_113 : f32 to vector<16x64xf32>
    %233 = arith.cmpf ogt, %231, %232 : vector<16x64xf32>
    %cst_114 = arith.constant 0.00999999977 : f32
    %234 = vector.broadcast %cst_114 : f32 to vector<16x64xf32>
    %235 = arith.mulf %234, %231 : vector<16x64xf32>
    %236 = arith.select %233, %231, %235 : vector<16x64xi1>, vector<16x64xf32>
    %c0_115 = arith.constant 0 : index
    %c0_116 = arith.constant 0 : index
    %237 = vector.load %arg18[%c0_115, %c0_116] : memref<16x64xf32, #tpu.memory_space<vmem>>, vector<16x64xf32>
    tpu.vector_store %arg18[%c0_115, %c0_116], %236 {strides = array<i32>} : memref<16x64xf32, #tpu.memory_space<vmem>>, vector<16x64xf32>,
    return
  }
}

</mosaic_0001>

<bundles_post_ra>
// kernel: tpu_custom_call.1
= control target key start
LH: loop header
LB: loop body
LE: loop exit
PB: predicated region body
PF: predicated region fallthrough
CT: control target
= control target key end

     0   :  { %s1845_s0 = inlined_call_operand.hbm [shape: f32[16,64], index: 0, kind: input, shape index: {}]   ;;  %s1846_s1 = inlined_call_operand.hbm [shape: f32[16,16], index: 1, kind: input, shape index: {}]   ;;  %s1847_s2 = inlined_call_operand.hbm [shape: f32[8,16,16], index: 2, kind: input, shape index: {}]   ;;  %s1848_s3 = inlined_call_operand.hbm [shape: f32[64,64], index: 3, kind: input, shape index: {}]   ;;  %s1849_s4 = inlined_call_operand.vmem [shape: f32[1,64], index: 4, kind: input, shape index: {}]   ;;  %s1850_s5 = inlined_call_operand.vmem [shape: f32[1,64], index: 5, kind: input, shape index: {}]   ;;  %s1851_s6 = inlined_call_operand.vmem [shape: f32[1,64], index: 6, kind: input, shape index: {}]   ;;  %s1852_s7 = inlined_call_operand.vmem [shape: f32[8,64], index: 7, kind: input, shape index: {}]   ;;  %s1853_s8 = inlined_call_operand.vmem [shape: f32[1,64], index: 8, kind: input, shape index: {}]   ;;  %s1854_s9 = inlined_call_operand.hbm [shape: f32[64,64], index: 9, kind: input, shape index: {}]   ;;  %s1855_s10 = inlined_call_operand.vmem [shape: f32[1,64], index: 10, kind: input, shape index: {}]   ;;  %s1856_s11 = inlined_call_operand.vmem [shape: f32[1,64], index: 11, kind: input, shape index: {}]   ;;  %s1857_s12 = inlined_call_operand.vmem [shape: f32[1,64], index: 12, kind: input, shape index: {}]   ;;  %s1858_s13 = inlined_call_operand.vmem [shape: f32[8,64], index: 13, kind: input, shape index: {}]   ;;  %s1859_s14 = inlined_call_operand.vmem [shape: f32[1,64], index: 14, kind: input, shape index: {}]   ;;  %s1860_s15 = inlined_call_operand.vmem [shape: f32[1,64], index: 15, kind: input, shape index: {}]   ;;  %s1861_s16 = inlined_call_operand.vmem [shape: f32[1,64], index: 16, kind: input, shape index: {}]   ;;  %s1862_s17 = inlined_call_operand.vmem [shape: f32[1,64], index: 17, kind: input, shape index: {}]   ;;  %s1863_s18 = inlined_call_operand.hbm [shape: f32[16,64], index: 18, kind: output, shape index: {}]  }
   0x1   :  { %1868 = sst [smem:[#allocation16_spill]] %s1845_s0 }
   0x2   :  { %1869 = sst [smem:[#allocation17_spill]] %s1846_s1 }
   0x3   :  { %1870 = sst [smem:[#allocation18_spill]] %s1847_s2 }
   0x4   :  { %1871 = sst [smem:[#allocation19_spill]] %s1859_s14 }
   0x5   :  { %1872 = sst [smem:[#allocation20_spill]] %s1863_s18 }
   0x6   :  { %23 = vsyncpa [#allocation3], 0 }
   0x7   :  { %24 = vsyncpa [#allocation6], 0 }
   0x8   :  { %25 = vsyncpa [#allocation9], 0 }
   0x9   :  { %26 = vsyncpa [#allocation4], 0  ;;  %s1400_s27 = smov [#allocation5]   ;;  %s1401_s29 = smov [#allocation8]  }
   0xa   :  { %s44_s28 = sshll.u32 %s1400_s27, 4  ;;  %s68_s30 = sshll.u32 %s1401_s29, 4  ;;  %s45_s28 = int_to_ptr.vmem [resolvable:$true] %s44_s28  ;;  %s1506_s30 = int_to_ptr.vmem [resolvable:$true] %s68_s30 }
   0xb   :  { %s1873_s1 = sld [smem:[#allocation17_spill]] }
  0x11   :  { %s1260_s20 = scalar_lea.hbm %s1873_s1, 256 }
  0x12   :  { %p1261_p0 = scmp.ne.s32.totalorder %s1873_s1, %s1260_s20  ;;  %p1264_p1 = scmp.lt.u32.totalorder %s1260_s20, %s1873_s1 }
  0x14   :  { %p1266_p2 = pnand %p1264_p1, %p1261_p0 }
  0x16   :  { %1269 = shalt.err (!%p1266_p2)
}
  0x17   :  { %s1270_s24 = scalar_lea.vmem %s45_s28, 256  ;;  %p1275_p4 = scmp.lt.s32.totalorder %s45_s28, %s45_s28 }
  0x18   :  { %p1271_p3 = scmp.ne.s32.totalorder %s45_s28, %s1270_s24  ;;  %p1276_p5 = scmp.lt.s32.totalorder %s1270_s24, %s1270_s24 }
  0x1a   :  { %p1277_p6 = por %p1276_p5, %p1275_p4 }
  0x1c   :  { %p1278_p7 = pnand %p1277_p6, %p1271_p3 }
  0x1e   :  { %1281 = shalt.err (!%p1278_p7)
}
  0x1f   :  { %s1402_s25 = smov 128   ;;  %s1403_s26 = smov 8  }
  0x20   :  { %50 = dma.hbm_to_vmem [thread:$0]  %s1873_s1, 256, %s45_s28, [#allocation6], %s1402_s25, %s1402_s25, %s1403_s26  }
  0x21   :  { %s1282_s20 = scalar_lea.hbm %s1848_s3, 1024 }
  0x22   :  { %p1283_p8 = scmp.ne.s32.totalorder %s1848_s3, %s1282_s20  ;;  %p1286_p9 = scmp.lt.u32.totalorder %s1282_s20, %s1848_s3 }
  0x24   :  { %p1288_p10 = pnand %p1286_p9, %p1283_p8 }
  0x26   :  { %1291 = shalt.err (!%p1288_p10)
}
  0x27   :  { %s1292_s24 = scalar_lea.vmem %s1506_s30, 1024  ;;  %p1297_p12 = scmp.lt.s32.totalorder %s1506_s30, %s1506_s30 }
  0x28   :  { %p1293_p11 = scmp.ne.s32.totalorder %s1506_s30, %s1292_s24  ;;  %p1298_p13 = scmp.lt.s32.totalorder %s1292_s24, %s1292_s24 }
  0x2a   :  { %p1299_p0 = por %p1298_p13, %p1297_p12 }
  0x2c   :  { %p1300_p1 = pnand %p1299_p0, %p1293_p11 }
  0x2e   :  { %1303 = shalt.err (!%p1300_p1)
}
  0x2f   :  { %74 = dma.hbm_to_vmem [thread:$0]  %s1848_s3, 1024, %s1506_s30, [#allocation9], %s1402_s25, %s1402_s25, %s1403_s26  }
  0x30   :  { %s1404_s27 = smov [#allocation2]   ;;  %s1405_s0 = smov [#allocation7]  }
  0x31   :  { %s32_s29 = sshll.u32 %s1404_s27, 4  ;;  %s56_s19 = sshll.u32 %s1405_s0, 4  ;;  %s33_s29 = int_to_ptr.vmem [resolvable:$true] %s32_s29  ;;  %s1543_s19 = int_to_ptr.vmem [resolvable:$true] %s56_s19 }
  0x32   :  { %s1874_s22 = sld [smem:[#allocation16_spill]] }
  0x38   :  { %s1304_s2 = scalar_lea.hbm %s1874_s22, 256 }
  0x39   :  { %p1305_p2 = scmp.ne.s32.totalorder %s1874_s22, %s1304_s2  ;;  %p1308_p3 = scmp.lt.u32.totalorder %s1304_s2, %s1874_s22 }
  0x3b   :  { %p1310_p4 = pnand %p1308_p3, %p1305_p2 }
  0x3d   :  { %1313 = shalt.err (!%p1310_p4)
}
  0x3e   :  { %s1314_s3 = scalar_lea.vmem %s33_s29, 256  ;;  %p1319_p6 = scmp.lt.s32.totalorder %s33_s29, %s33_s29 }
  0x3f   :  { %p1315_p5 = scmp.ne.s32.totalorder %s33_s29, %s1314_s3  ;;  %p1320_p7 = scmp.lt.s32.totalorder %s1314_s3, %s1314_s3 }
  0x41   :  { %p1321_p8 = por %p1320_p7, %p1319_p6 }
  0x43   :  { %p1322_p9 = pnand %p1321_p8, %p1315_p5 }
  0x45   :  { %1325 = shalt.err (!%p1322_p9)
}
  0x46   :  { %38 = dma.hbm_to_vmem [thread:$0]  %s1874_s22, 256, %s33_s29, [#allocation3], %s1402_s25, %s1402_s25, %s1403_s26  }
  0x47   :  { %s1875_s14 = sld [smem:[#allocation18_spill]] }
  0x4d   :  { %s1326_s18 = scalar_lea.hbm %s1875_s14, 2048 }
  0x4e   :  { %p1327_p10 = scmp.ne.s32.totalorder %s1875_s14, %s1326_s18  ;;  %p1330_p11 = scmp.lt.u32.totalorder %s1326_s18, %s1875_s14 }
  0x50   :  { %p1332_p12 = pnand %p1330_p11, %p1327_p10 }
  0x52   :  { %1335 = shalt.err (!%p1332_p12)
}
  0x53   :  { %s1336_s23 = scalar_lea.vmem %s1543_s19, 2048  ;;  %p1341_p0 = scmp.lt.s32.totalorder %s1543_s19, %s1543_s19 }
  0x54   :  { %p1337_p13 = scmp.ne.s32.totalorder %s1543_s19, %s1336_s23  ;;  %p1342_p1 = scmp.lt.s32.totalorder %s1336_s23, %s1336_s23 }
  0x56   :  { %p1343_p2 = por %p1342_p1, %p1341_p0 }
  0x58   :  { %p1344_p3 = pnand %p1343_p2, %p1337_p13 }
  0x5a   :  { %1347 = shalt.err (!%p1344_p3)
}
  0x5b   :  { %62 = dma.hbm_to_vmem [thread:$0]  %s1875_s14, 2048, %s1543_s19, [#allocation6], %s1402_s25, %s1402_s25, %s1403_s26  }
  0x5c   :  { %s1406_s24 = smov [#allocation10]   ;;  %s1348_s1 = scalar_lea.hbm %s1854_s9, 1024 }
  0x5d   :  { %s90_s3 = sshll.u32 %s1406_s24, 4  ;;  %p1349_p4 = scmp.ne.s32.totalorder %s1854_s9, %s1348_s1  ;;  %s91_s3 = int_to_ptr.vmem [resolvable:$true] %s90_s3 }
  0x5e   :  { %p1352_p5 = scmp.lt.u32.totalorder %s1348_s1, %s1854_s9 }
  0x60   :  { %p1354_p6 = pnand %p1352_p5, %p1349_p4 }
  0x62   :  { %1357 = shalt.err (!%p1354_p6)
}
  0x63   :  { %s1358_s21 = scalar_lea.vmem %s91_s3, 1024  ;;  %p1363_p8 = scmp.lt.s32.totalorder %s91_s3, %s91_s3 }
  0x64   :  { %p1359_p7 = scmp.ne.s32.totalorder %s91_s3, %s1358_s21  ;;  %p1364_p9 = scmp.lt.s32.totalorder %s1358_s21, %s1358_s21 }
  0x66   :  { %p1365_p10 = por %p1364_p9, %p1363_p8 }
  0x68   :  { %p1366_p11 = pnand %p1365_p10, %p1359_p7 }
  0x6a   :  { %1369 = shalt.err (!%p1366_p11)
}
  0x6b   :  { %96 = dma.hbm_to_vmem [thread:$0]  %s1854_s9, 1024, %s91_s3, [#allocation9], %s1402_s25, %s1402_s25, %s1403_s26  }
  0x6c   :  { %1392 = dma.done.wait [#allocation3], 256  }
  0x6d   :  { %1393 = vsyncadd [#allocation3], 4294967040 }
  0x6e   :  { %1394 = dma.done.wait [#allocation6], 2304  }
  0x6f   :  { %1395 = vsyncadd [#allocation6], 4294964992 }
  0x70   :  { %1396 = dma.done.wait [#allocation9], 2048  }
  0x71   :  { %1397 = vsyncadd [#allocation9], 4294965248  ;;  %v132_v0 = vld [vmem:[#allocation8] sm:$0xff]  ;;  %v133_v1 = vld [vmem:[#allocation8 + $0x8] sm:$0xff]  ;;  %vm140_vm0 = vcmask 523264   ;;  %v1407_v18 = vmov 0.0|0.0   ;;  %v317_v30 = vlaneseq }
  0x72   :  { %v134_v2 = vld [vmem:[#allocation8 + $0x10] sm:$0xff]  ;;  %v1181_v3 = vpack.c.bf16 %v133_v1, %v132_v0  ;;  %v135_v4 = vld [vmem:[#allocation8 + $0x18] sm:$0xff]  ;;  %v136_v6 = vld [vmem:[#allocation8 + $0x20] sm:$0xff]  ;;  %1197 = vmatprep.subr.bf16.mxu1 %v1407_v18  ;;  %vm1408_vm1 = vmmov 0   ;;  %v1409_v19 = vmov 0.0   ;;  %vm432_vm7 = vcmask 130048  }
  0x73   :  { %v1185_v5 = vpack.c.bf16 %v135_v4, %v134_v2  ;;  %v137_v7 = vld [vmem:[#allocation8 + $0x28] sm:$0xff]  ;;  %v1595_v8 = vld [vmem:[#allocation2] sm:$0xff]  ;;  %v138_v10 = vld [vmem:[#allocation8 + $0x30] sm:$0xff]  ;;  %1138 = vmatprep.mubr.msk.f32.mxu1 %vm1408_vm1, %v1409_v19  ;;  %v1627_v31 = vshrl.u32 %v317_v30, 7  ;;  %s1878_s21 = sld [smem:[#allocation19_spill]]  ;;  %s1410_s19 = smov [#allocation11]  }
  0x74   :  { %1182 = vmatprep.subr.bf16.mxu0 %v1181_v3  ;;  %1131 = vmatprep.mubr.msk.f32.mxu0 %vm140_vm0, %v1595_v8  ;;  %v1189_v9 = vpack.c.bf16 %v137_v7, %v136_v6  ;;  %v139_v11 = vld [vmem:[#allocation8 + $0x38] sm:$0xff]  ;;  %v1599_v13 = vld [vmem:[#allocation2 + $0x8] sm:$0xff]  ;;  %v323_v14 = vld [vmem:[%s1852_s7] sm:$0xff]  ;;  %s1046_s14 = sshll.u32 %s1410_s19, 4  ;;  %s1047_s14 = int_to_ptr.vmem [resolvable:$true] %s1046_s14 }
  0x75   :  { %1184 = vmatpush3.bf16.msra.mxu0 %v1181_v3  ;;  %v1193_v12 = vpack.c.bf16 %v139_v11, %v138_v10  ;;  %v1066_v15 = vld [vmem:[%s1851_s6] ss:$0 sm:$0xff]  ;;  %vm1615_vm2 = vmpackc.low %vm140_vm0, %vm140_vm0  ;;  %v1630_v32 = vsub.s32 0, %v1627_v31  ;;  %v348_v33 = vsub.s32 1, %v1627_v31  ;;  %v359_v35 = vsub.s32 2, %v1627_v31  ;;  %v1639_v39 = vld [vmem:[#allocation7 + $0x10] sm:$0xff]  ;;  %p1375_p13 = scmp.lt.s32.totalorder %s1047_s14, %s1047_s14 }
  0x76   :  { %1186 = vmatprep.subr.bf16.mxu0 %v1185_v5  ;;  %v331_v16 = vmul.f32 %v1066_v15, %v323_v14  ;;  %v1062_v20 = vld [vmem:[%s1850_s5] ss:$0 sm:$0xff]  ;;  %v1641_v40 = vld [vmem:[#allocation7 + $0x8] sm:$0xff]  ;;  %v1643_v41 = vld [vmem:[#allocation7 + $0x18] sm:$0xff]  ;;  %v370_v48 = vsub.s32 3, %v1627_v31  ;;  %v381_v55 = vsub.s32 4, %v1627_v31 }
  0x77   :  { %v237_v29 = vld [vmem:[%s1849_s4] sm:$0x1]  ;;  %v1654_v49 = vld [vmem:[#allocation7 + $0x28] sm:$0xff]  ;;  %v1661_v56 = vld [vmem:[#allocation7 + $0x30] sm:$0xff]  ;;  %v392_v59 = vsub.s32 5, %v1627_v31  ;;  %v403_v3 = vsub.s32 6, %v1627_v31 }
  0x78   :  { %v332_v17 = vsel %vm140_vm0, %v331_v16, 0.0  ;;  %v1637_v38 = vld [vmem:[#allocation7] sm:$0xff]  ;;  %v1663_v57 = vld [vmem:[#allocation7 + $0x38] sm:$0xff]  ;;  %v1672_v1 = vld [vmem:[#allocation7 + $0x48] sm:$0xff]  ;;  %s1370_s9 = scalar_lea.vmem %s1047_s14, 256 }
  0x79   :  { %1188 = vmatpush3.bf16.msra.mxu0 %v1185_v5  ;;  %333 = vadd.xlane.f32.xlu0 %v332_v17  ;;  %v1651_v47 = vld [vmem:[#allocation7 + $0x20] sm:$0xff]  ;;  %v1681_v10 = vld [vmem:[#allocation7 + $0x58] sm:$0xff]  ;;  %p1371_p12 = scmp.ne.s32.totalorder %s1047_s14, %s1370_s9  ;;  %p1376_p0 = scmp.lt.s32.totalorder %s1370_s9, %s1370_s9 }
  0x7a   :  { %1190 = vmatprep.subr.bf16.mxu0 %v1189_v9  ;;  %v1670_v0 = vld [vmem:[#allocation7 + $0x40] sm:$0xff] }
  0x7b   :  { %v1687_v17 = vld [vmem:[#allocation7 + $0x60] sm:$0xff]  ;;  %p1377_p1 = por %p1376_p0, %p1375_p13 }
  0x7d   :  { %1192 = vmatpush3.bf16.msra.mxu0 %v1189_v9  ;;  %v1679_v9 = vld [vmem:[#allocation7 + $0x50] sm:$0xff]  ;;  %p1378_p2 = pnand %p1377_p1, %p1371_p12 }
  0x7e   :  { %1194 = vmatprep.subr.bf16.mxu0 %v1193_v12 }
  0x81   :  { %1196 = vmatpush3.bf16.msra.mxu0 %v1193_v12 }
  0x82   :  { %1221 = vmatprep.subr.bf16.mxu0 %v1407_v18  ;;  %v414_v18 = vsub.s32 7, %v1627_v31 }
  0x84   :  { %1132 = vmatmul.mubr.msk.f32.vlgmr.msra.gmra.mrb[0].mxu0 %vm140_vm0, %v1599_v13 }
  0x85   :  { %1171 = vmatprep.mubr.msk.f32.mxu0 %vm1408_vm1, %v1409_v19  ;;  %v1690_v19 = vld [vmem:[#allocation7 + $0x68] sm:$0xff] }
 0x106   :  { %v334_v34 = vpop.xlane.xlu0 %333 }
 0x107   :  { %v340_v36 = vrot.slane %v334_v34, %v1630_v32  ;;  %v349_v37 = vrot.slane %v334_v34, %v348_v33  ;;  %v360_v42 = vrot.slane %v334_v34, %v359_v35  ;;  %v371_v54 = vrot.slane %v334_v34, %v370_v48 }
 0x108   :  { %v382_v63 = vrot.slane %v334_v34, %v381_v55  ;;  %v393_v2 = vrot.slane %v334_v34, %v392_v59  ;;  %v404_v12 = vrot.slane %v334_v34, %v403_v3 }
 0x109   :  { %v341_v43 = vmul.f32 %v340_v36, %v1637_v38  ;;  %v350_v44 = vmul.f32 %v349_v37, %v1639_v39  ;;  %v342_v45 = vmul.f32 %v340_v36, %v1641_v40  ;;  %v351_v46 = vmul.f32 %v349_v37, %v1643_v41 }
 0x10a   :  { %v361_v51 = vmul.f32 %v360_v42, %v1651_v47  ;;  %v362_v53 = vmul.f32 %v360_v42, %v1654_v49  ;;  %v372_v61 = vmul.f32 %v371_v54, %v1661_v56  ;;  %v373_v62 = vmul.f32 %v371_v54, %v1663_v57 }
 0x10b   :  { %v352_v50 = vadd.f32 %v350_v44, %v341_v43  ;;  %v353_v52 = vadd.f32 %v351_v46, %v342_v45  ;;  %v383_v6 = vmul.f32 %v382_v63, %v1670_v0  ;;  %v384_v7 = vmul.f32 %v382_v63, %v1672_v1 }
 0x10c   :  { %v394_v11 = vmul.f32 %v393_v2, %v1679_v9  ;;  %v395_v16 = vmul.f32 %v393_v2, %v1681_v10 }
 0x10d   :  { %v363_v58 = vadd.f32 %v361_v51, %v352_v50  ;;  %v364_v60 = vadd.f32 %v362_v53, %v353_v52  ;;  %v1703_v52 = vld [vmem:[#allocation5 + $0x8] sm:$0xff]  ;;  %v1705_v53 = vld [vmem:[#allocation5] sm:$0xff] }
 0x10e   :  { %vm429_vm3 = vcmp.gt.f32.partialorder %v1703_v52, 0.0  ;;  %vm428_vm4 = vcmp.gt.f32.partialorder %v1705_v53, 0.0 }
 0x10f   :  { %v374_v4 = vadd.f32 %v372_v61, %v363_v58  ;;  %v375_v5 = vadd.f32 %v373_v62, %v364_v60 }
 0x111   :  { %v385_v14 = vadd.f32 %v383_v6, %v374_v4  ;;  %v386_v15 = vadd.f32 %v384_v7, %v375_v5 }
 0x157   :  { %v1133_v21 = vpop.f32.mrb[0].mxu0 }
 0x158   :  { %v213_v22 = vpop.f32.mrb[1].mxu0  ;;  %v230_v23 = vmul.f32 %v1133_v21, %v1062_v20 }
 0x159   :  { %v229_v25 = vmul.f32 %v1062_v20, %v213_v22  ;;  %v1198_v26 = vpack.c.bf16 %v1133_v21, %v213_v22  ;;  %v405_v20 = vmul.f32 %v404_v12, %v1687_v17  ;;  %v396_v21 = vadd.f32 %v394_v11, %v385_v14 }
 0x15a   :  { %v234_v27 = vsel %vm140_vm0, %v230_v23, 0.0  ;;  %v397_v22 = vadd.f32 %v395_v16, %v386_v15  ;;  %v406_v23 = vmul.f32 %v404_v12, %v1690_v19 }
 0x15b   :  { %235 = vadd.xlane.f32.xlu1 %v234_v27  ;;  %1200 = vmatpush3.bf16.xpose.msk.msra.mxu1 %vm1615_vm2, %v1198_v26  ;;  %v231_v28 = vsel %vm140_vm0, %v229_v25, 0.0  ;;  %v415_v25 = vrot.slane %v334_v34, %v414_v18  ;;  %v1698_v27 = vld [vmem:[#allocation7 + $0x78] sm:$0xff] }
 0x15c   :  { %1202 = vmatprep.subr.bf16.mxu1 %v1198_v26  ;;  %232 = vadd.xlane.f32.xlu0 %v231_v28  ;;  %v407_v28 = vadd.f32 %v405_v20, %v396_v21 }
 0x15d   :  { %v417_v36 = vmul.f32 %v415_v25, %v1698_v27 }
 0x162   :  { %1139 = vmatmul.mubr.msk.f32.vlgmr.msra.gmra.mrb[0].mxu1 %vm140_vm0, %v237_v29  ;;  %v408_v29 = vadd.f32 %v406_v23, %v397_v22 }
 0x163   :  { %1204 = vmatpush3.bf16.msra.mxu1 %v1198_v26  ;;  %v1696_v26 = vld [vmem:[#allocation7 + $0x70] sm:$0xff] }
 0x164   :  { %v416_v30 = vmul.f32 %v415_v25, %v1696_v26  ;;  %v419_v34 = vadd.f32 %v417_v36, %v408_v29 }
 0x166   :  { %v418_v51 = vadd.f32 %v416_v30, %v407_v28 }
 0x1e8   :  { %v236_v44 = vpop.xlane.xlu1 %235 }
 0x1e9   :  { %v233_v45 = vpop.xlane.xlu0 %232 }
 0x235   :  { %v313_v37 = vpop.f32.mrb[0].mxu1 }
 0x236   :  { %v320_v42 = vrot.slane %v313_v37, %v1630_v32  ;;  %v1140_v43 = vpop.f32.mrb[1].mxu1 }
 0x238   :  { %v321_v46 = vadd.f32 %v320_v42, %v233_v45  ;;  %v322_v50 = vadd.f32 %v320_v42, %v236_v44  ;;  %v603_v44 = vld [vmem:[#allocation10] sm:$0xff]  ;;  %v604_v45 = vld [vmem:[#allocation10 + $0x8] sm:$0xff] }
 0x23a   :  { %v420_v54 = vadd.f32 %v418_v51, %v321_v46  ;;  %v421_v58 = vadd.f32 %v419_v34, %v322_v50  ;;  %v1205_v46 = vpack.c.bf16 %v604_v45, %v603_v44  ;;  %v605_v50 = vld [vmem:[#allocation10 + $0x10] sm:$0xff]  ;;  %v606_v51 = vld [vmem:[#allocation10 + $0x18] sm:$0xff] }
 0x23b   :  { %v1209_v34 = vpack.c.bf16 %v606_v51, %v605_v50 }
 0x23c   :  { %vm423_vm5 = vcmp.gt.f32.partialorder %v421_v58, 0.0  ;;  %v425_v60 = vmul.f32 0.2, %v421_v58  ;;  %vm422_vm6 = vcmp.gt.f32.partialorder %v420_v54, 0.0  ;;  %v424_v61 = vmul.f32 0.2, %v420_v54  ;;  %1206 = vmatprep.subr.bf16.mxu1 %v1205_v46 }
 0x23e   :  { %v427_v62 = vsel %vm423_vm5, %v421_v58, %v425_v60  ;;  %v426_v63 = vsel %vm422_vm6, %v420_v54, %v424_v61  ;;  %v607_v54 = vld [vmem:[#allocation10 + $0x20] sm:$0xff]  ;;  %v608_v58 = vld [vmem:[#allocation10 + $0x28] sm:$0xff]  ;;  %v609_v61 = vld [vmem:[#allocation10 + $0x30] sm:$0xff] }
 0x23f   :  { %v431_v2 = vsel %vm429_vm3, %v427_v62, -1e+30  ;;  %v430_v4 = vsel %vm428_vm4, %v426_v63, -1e+30  ;;  %v1213_v60 = vpack.c.bf16 %v608_v58, %v607_v54  ;;  %v610_v62 = vld [vmem:[#allocation10 + $0x38] sm:$0xff] }
 0x240   :  { %v436_v5 = vsel %vm432_vm7, %v431_v2, -inf  ;;  %v433_v6 = vsel %vm432_vm7, %v430_v4, -inf  ;;  %v1217_v63 = vpack.c.bf16 %v610_v62, %v609_v61 }
 0x241   :  { %437 = vmax.xlane.f32.xlu0 %v436_v5  ;;  %434 = vmax.xlane.f32.xlu1 %v433_v6 }
 0x2ce   :  { %v435_v7 = vpop.xlane.xlu1 %434  ;;  %v438_v11 = vpop.xlane.xlu0 %437 }
 0x2cf   :  { %v439_v12 = vsub.f32 %v430_v4, %v435_v7  ;;  %v440_v14 = vsub.f32 %v431_v2, %v438_v11  ;;  %v793_v2 = vld [vmem:[%s1858_s13] sm:$0xff] }
 0x2d0   :  { %v1077_v4 = vld [vmem:[%s1857_s12] ss:$0 sm:$0xff] }
 0x2d1   :  { %v441_v15 = vmul.f32 1.442695, %v439_v12  ;;  %v443_v16 = vmul.f32 1.442695, %v440_v14  ;;  %v801_v5 = vmul.f32 %v1077_v4, %v793_v2  ;;  %v1067_v7 = vld [vmem:[%s1853_s8] ss:$0 sm:$0xff] }
 0x2d3   :  { %1240 = vpow2.f32 %v441_v15  ;;  %v802_v6 = vsel %vm140_vm0, %v801_v5, 0.0 }
 0x2d4   :  { %1242 = vpow2.f32 %v443_v16 }
 0x2dd   :  { %v1241_v20 = vpop.eup %1240 }
 0x2de   :  { %v1243_v21 = vpop.eup %1242  ;;  %v445_v22 = vmul.f32 %v1241_v20, %v1705_v53 }
 0x2df   :  { %v446_v23 = vmul.f32 %v1243_v21, %v1703_v52 }
 0x2e0   :  { %v447_v25 = vsel %vm432_vm7, %v445_v22, 0.0 }
 0x2e1   :  { %448 = vadd.xlane.f32.xlu1 %v447_v25  ;;  %v450_v28 = vsel %vm432_vm7, %v446_v23, 0.0 }
 0x2e2   :  { %451 = vadd.xlane.f32.xlu0 %v450_v28 }
 0x2e5   :  { %803 = vadd.xlane.f32.xlu1 %v802_v6  ;;  %v1745_v6 = vld [vmem:[%s1860_s15] sm:$0x1] }
 0x36e   :  { %v449_v29 = vpop.xlane.xlu1 %448 }
 0x36f   :  { %1244 = vrcp.f32 %v449_v29  ;;  %v452_v30 = vpop.xlane.xlu0 %451 }
 0x370   :  { %1246 = vrcp.f32 %v452_v30 }
 0x379   :  { %v1245_v36 = vpop.eup %1244 }
 0x37a   :  { %v1247_v37 = vpop.eup %1246  ;;  %v454_v42 = vmul.f32 %v1245_v36, %v445_v22  ;;  %v1736_v36 = vld [vmem:[%s1862_s17] sm:$0x1] }
 0x37b   :  { %v456_v43 = vmul.f32 %v1247_v37, %v446_v23 }
 0x37c   :  { %1145 = vmatprep.mubr.msk.f32.mxu1 %vm432_vm7, %v454_v42 }
 0x37d   :  { %1146 = vmatmul.mubr.msk.f32.vlgmr.msra.gmra.mrb[2].mxu1 %vm432_vm7, %v456_v43 }
 0x37e   :  { %1208 = vmatpush3.bf16.msra.mxu1 %v1205_v46 }
 0x37f   :  { %1210 = vmatprep.subr.bf16.mxu1 %v1209_v34 }
 0x382   :  { %1212 = vmatpush3.bf16.msra.mxu1 %v1209_v34 }
 0x383   :  { %1214 = vmatprep.subr.bf16.mxu1 %v1213_v60 }
 0x386   :  { %1216 = vmatpush3.bf16.msra.mxu1 %v1213_v60 }
 0x387   :  { %1218 = vmatprep.subr.bf16.mxu1 %v1217_v63 }
 0x38a   :  { %1220 = vmatpush3.bf16.msra.mxu1 %v1217_v63 }
 0x450   :  { %v1147_v11 = vpop.f32.mrb[2].mxu1 }
 0x451   :  { %v542_v12 = vadd.f32 %v1147_v11, %v1067_v7  ;;  %v536_v14 = vpop.f32.mrb[3].mxu1 }
 0x452   :  { %v537_v15 = vadd.f32 %v1067_v7, %v536_v14  ;;  %v1752_v14 = vld [vmem:[%s1861_s16] ss:$0 sm:$0xff] }
 0x453   :  { %v546_v16 = vsel %vm140_vm0, %v542_v12, 0.0 }
 0x454   :  { %v545_v20 = vsel %vm140_vm0, %v537_v15, 0.0 }
 0x455   :  { %v547_v21 = vadd.f32 %v546_v16, %v545_v20 }
 0x457   :  { %v548_v22 = vrot.slane %v547_v21, 4 }
 0x459   :  { %v549_v23 = vadd.f32 %v548_v22, %v547_v21 }
 0x45b   :  { %v550_v25 = vrot.slane %v549_v23, 2 }
 0x45d   :  { %v551_v28 = vadd.f32 %v550_v25, %v549_v23 }
 0x45f   :  { %v552_v29 = vrot.slane %v551_v28, 1 }
 0x461   :  { %v553_v30 = vadd.f32 %v552_v29, %v551_v28  ;;  %v1073_v29 = vld [vmem:[%s1856_s11] ss:$0 sm:$0xff] }
 0x463   :  { %v555_v37 = vmul.f32 0.0625, %v553_v30 }
 0x465   :  { %v557_v42 = vmul.f32 %v1736_v36, %v555_v37 }
 0x467   :  { %v561_v43 = vrot.slane %v557_v42, %v1630_v32 }
 0x469   :  { %v562_v44 = vsub.f32 %v537_v15, %v561_v43  ;;  %v563_v45 = vsub.f32 %v542_v12, %v561_v43 }
 0x46b   :  { %v564_v46 = vmul.f32 %v562_v44, %v562_v44  ;;  %v565_v50 = vmul.f32 %v563_v45, %v563_v45 }
 0x46d   :  { %v566_v51 = vsel %vm140_vm0, %v564_v46, 0.0  ;;  %v567_v34 = vsel %vm140_vm0, %v565_v50, 0.0  ;;  %v707_v50 = vld [vmem:[%s1855_s10] sm:$0x1] }
 0x46e   :  { %v568_v54 = vadd.f32 %v567_v34, %v566_v51  ;;  %v804_v51 = vpop.xlane.xlu1 %803 }
 0x46f   :  { %v808_v34 = vrot.slane %v804_v51, %v1630_v32 }
 0x470   :  { %v569_v58 = vrot.slane %v568_v54, 4 }
 0x471   :  { %v809_v24 = vmul.f32 %v808_v34, %v1637_v38  ;;  %v838_v38 = vrot.slane %v804_v51, %v381_v55 }
 0x472   :  { %v570_v60 = vadd.f32 %v569_v58, %v568_v54  ;;  %v814_v54 = vrot.slane %v804_v51, %v348_v33  ;;  %v830_v33 = vrot.slane %v804_v51, %v370_v48  ;;  %v854_v48 = vrot.slane %v804_v51, %v403_v3 }
 0x474   :  { %v571_v61 = vrot.slane %v570_v60, 2  ;;  %v815_v58 = vmul.f32 %v814_v54, %v1639_v39 }
 0x476   :  { %v572_v62 = vadd.f32 %v571_v61, %v570_v60  ;;  %v822_v60 = vrot.slane %v804_v51, %v359_v35  ;;  %v810_v61 = vmul.f32 %v808_v34, %v1641_v40  ;;  %v831_v35 = vmul.f32 %v830_v33, %v1661_v56 }
 0x477   :  { %v832_v40 = vmul.f32 %v830_v33, %v1663_v57  ;;  %v855_v57 = vmul.f32 %v854_v48, %v1687_v17 }
 0x478   :  { %v573_v63 = vrot.slane %v572_v62, 1 }
 0x47a   :  { %v574_v2 = vadd.f32 %v573_v63, %v572_v62  ;;  %v816_v62 = vmul.f32 %v814_v54, %v1643_v41  ;;  %v817_v63 = vadd.f32 %v815_v58, %v809_v24  ;;  %v839_v41 = vmul.f32 %v838_v38, %v1670_v0 }
 0x47c   :  { %v575_v4 = vmul.f32 0.0625, %v574_v2  ;;  %v818_v2 = vadd.f32 %v816_v62, %v810_v61 }
 0x47e   :  { %v577_v5 = vadd.f32 1e-05, %v575_v4  ;;  %v823_v4 = vmul.f32 %v822_v60, %v1651_v47  ;;  %v840_v47 = vmul.f32 %v838_v38, %v1672_v1  ;;  %v862_v1 = vrot.slane %v804_v51, %v414_v18 }
 0x480   :  { %1248 = vrsqrt.f32 %v577_v5  ;;  %v824_v5 = vmul.f32 %v822_v60, %v1654_v49  ;;  %v825_v39 = vadd.f32 %v823_v4, %v817_v63  ;;  %v846_v49 = vrot.slane %v804_v51, %v392_v59 }
 0x481   :  { %v864_v3 = vmul.f32 %v862_v1, %v1698_v27 }
 0x482   :  { %v848_v56 = vmul.f32 %v846_v49, %v1681_v10 }
 0x48a   :  { %v1249_v7 = vpop.eup %1248 }
 0x48b   :  { %v579_v11 = vmul.f32 %v1249_v7, %v1745_v6  ;;  %v826_v7 = vadd.f32 %v824_v5, %v818_v2 }
 0x48d   :  { %v584_v12 = vrot.slane %v579_v11, %v1630_v32  ;;  %v833_v11 = vadd.f32 %v831_v35, %v825_v39 }
 0x48f   :  { %v586_v15 = vmul.f32 %v584_v12, %v562_v44  ;;  %v587_v16 = vmul.f32 %v584_v12, %v563_v45  ;;  %v834_v12 = vadd.f32 %v832_v40, %v826_v7 }
 0x491   :  { %v595_v20 = vadd.f32 %v1752_v14, %v586_v15  ;;  %v596_v21 = vadd.f32 %v1752_v14, %v587_v16  ;;  %v841_v15 = vadd.f32 %v839_v41, %v833_v11  ;;  %v842_v55 = vadd.f32 %v840_v47, %v834_v12 }
 0x492   :  { %v847_v16 = vmul.f32 %v846_v49, %v1679_v9 }
 0x493   :  { %vm597_vm8 = vcmp.gt.f32.partialorder %v595_v20, 0.0  ;;  %v599_v22 = vmul.f32 0.01, %v595_v20  ;;  %vm598_vm9 = vcmp.gt.f32.partialorder %v596_v21, 0.0  ;;  %v600_v23 = vmul.f32 0.01, %v596_v21 }
 0x494   :  { %v850_v0 = vadd.f32 %v848_v56, %v842_v55 }
 0x495   :  { %v601_v25 = vsel %vm597_vm8, %v595_v20, %v599_v22  ;;  %v602_v28 = vsel %vm598_vm9, %v596_v21, %v600_v23  ;;  %v849_v20 = vadd.f32 %v847_v16, %v841_v15  ;;  %v856_v21 = vmul.f32 %v854_v48, %v1690_v19 }
 0x496   :  { %1164 = vmatprep.mubr.msk.f32.mxu1 %vm140_vm0, %v601_v25  ;;  %v863_v23 = vmul.f32 %v862_v1, %v1696_v26 }
 0x497   :  { %1165 = vmatmul.mubr.msk.f32.vlgmr.msra.gmra.mrb[4].mxu1 %vm140_vm0, %v602_v28  ;;  %v857_v22 = vadd.f32 %v855_v57, %v849_v20  ;;  %v858_v59 = vadd.f32 %v856_v21, %v850_v0 }
 0x56a   :  { %v1166_v30 = vpop.f32.mrb[4].mxu1 }
 0x56b   :  { %v683_v37 = vpop.f32.mrb[5].mxu1  ;;  %v700_v42 = vmul.f32 %v1166_v30, %v1073_v29 }
 0x56c   :  { %v699_v43 = vmul.f32 %v1073_v29, %v683_v37  ;;  %v1222_v44 = vpack.c.bf16 %v1166_v30, %v683_v37  ;;  %v865_v37 = vadd.f32 %v863_v23, %v857_v22 }
 0x56d   :  { %v704_v45 = vsel %vm140_vm0, %v700_v42, 0.0  ;;  %v866_v42 = vadd.f32 %v864_v3, %v858_v59 }
 0x56e   :  { %705 = vadd.xlane.f32.xlu1 %v704_v45  ;;  %1224 = vmatpush3.bf16.xpose.msk.msra.mxu0 %vm1615_vm2, %v1222_v44  ;;  %v701_v46 = vsel %vm140_vm0, %v699_v43, 0.0 }
 0x56f   :  { %1226 = vmatprep.subr.bf16.mxu0 %v1222_v44  ;;  %702 = vadd.xlane.f32.xlu0 %v701_v46 }
 0x575   :  { %1172 = vmatmul.mubr.msk.f32.vlgmr.msra.gmra.mrb[2].mxu0 %vm140_vm0, %v707_v50 }
 0x576   :  { %1228 = vmatpush3.bf16.msra.mxu0 %v1222_v44 }
 0x5fb   :  { %v706_v10 = vpop.xlane.xlu1 %705 }
 0x5fc   :  { %v703_v29 = vpop.xlane.xlu0 %702 }
 0x648   :  { %v783_v25 = vpop.f32.mrb[2].mxu0 }
 0x649   :  { %v790_v9 = vrot.slane %v783_v25, %v1630_v32  ;;  %v1173_v28 = vpop.f32.mrb[3].mxu0 }
 0x64b   :  { %v791_v17 = vadd.f32 %v790_v9, %v703_v29  ;;  %v792_v30 = vadd.f32 %v790_v9, %v706_v10 }
 0x64d   :  { %v867_v19 = vadd.f32 %v865_v37, %v791_v17  ;;  %v868_v43 = vadd.f32 %v866_v42, %v792_v30 }
 0x64f   :  { %vm870_vm10 = vcmp.gt.f32.partialorder %v868_v43, 0.0  ;;  %v872_v31 = vmul.f32 0.2, %v868_v43  ;;  %vm869_vm11 = vcmp.gt.f32.partialorder %v867_v19, 0.0  ;;  %v871_v18 = vmul.f32 0.2, %v867_v19 }
 0x651   :  { %v874_v44 = vsel %vm870_vm10, %v868_v43, %v872_v31  ;;  %v873_v26 = vsel %vm869_vm11, %v867_v19, %v871_v18 }
 0x652   :  { %v876_v27 = vsel %vm429_vm3, %v874_v44, -1e+30  ;;  %v875_v45 = vsel %vm428_vm4, %v873_v26, -1e+30 }
 0x653   :  { %v880_v46 = vsel %vm432_vm7, %v876_v27, -inf  ;;  %v877_v50 = vsel %vm432_vm7, %v875_v45, -inf }
 0x654   :  { %881 = vmax.xlane.f32.xlu1 %v880_v46  ;;  %878 = vmax.xlane.f32.xlu0 %v877_v50 }
 0x6e1   :  { %v882_v51 = vpop.xlane.xlu1 %881  ;;  %v879_v34 = vpop.xlane.xlu0 %878 }
 0x6e2   :  { %v884_v54 = vsub.f32 %v876_v27, %v882_v51  ;;  %v883_v24 = vsub.f32 %v875_v45, %v879_v34 }
 0x6e4   :  { %v887_v58 = vmul.f32 1.442695, %v884_v54  ;;  %v885_v60 = vmul.f32 1.442695, %v883_v24 }
 0x6e6   :  { %1250 = vpow2.f32 %v887_v58 }
 0x6e7   :  { %1252 = vpow2.f32 %v885_v60 }
 0x6f0   :  { %v1251_v61 = vpop.eup %1250 }
 0x6f1   :  { %v1253_v62 = vpop.eup %1252  ;;  %v890_v63 = vmul.f32 %v1251_v61, %v1703_v52  ;;  %v1078_v52 = vld [vmem:[%s1878_s21] ss:$0 sm:$0xff] }
 0x6f2   :  { %v889_v2 = vmul.f32 %v1253_v62, %v1705_v53 }
 0x6f3   :  { %v894_v4 = vsel %vm432_vm7, %v890_v63, 0.0 }
 0x6f4   :  { %895 = vadd.xlane.f32.xlu1 %v894_v4  ;;  %v891_v5 = vsel %vm432_vm7, %v889_v2, 0.0 }
 0x6f5   :  { %892 = vadd.xlane.f32.xlu0 %v891_v5 }
 0x781   :  { %v896_v33 = vpop.xlane.xlu1 %895 }
 0x782   :  { %1254 = vrcp.f32 %v896_v33  ;;  %v893_v38 = vpop.xlane.xlu0 %892 }
 0x783   :  { %1256 = vrcp.f32 %v893_v38 }
 0x78c   :  { %v1255_v39 = vpop.eup %1254 }
 0x78d   :  { %v1257_v7 = vpop.eup %1256  ;;  %v900_v35 = vmul.f32 %v1255_v39, %v890_v63 }
 0x78e   :  { %v898_v40 = vmul.f32 %v1257_v7, %v889_v2 }
 0x790   :  { %1178 = vmatprep.mubr.msk.f32.mxu0 %vm432_vm7, %v898_v40 }
 0x791   :  { %1179 = vmatmul.mubr.msk.f32.vlgmr.msra.gmra.mrb[4].mxu0 %vm432_vm7, %v900_v35 }
 0x864   :  { %v1180_v53 = vpop.f32.mrb[4].mxu0 }
 0x865   :  { %v986_v41 = vadd.f32 %v1180_v53, %v1078_v52  ;;  %v980_v11 = vpop.f32.mrb[5].mxu0 }
 0x866   :  { %v981_v12 = vadd.f32 %v1078_v52, %v980_v11 }
 0x867   :  { %v990_v47 = vsel %vm140_vm0, %v986_v41, 0.0 }
 0x868   :  { %v989_v49 = vsel %vm140_vm0, %v981_v12, 0.0 }
 0x869   :  { %v991_v48 = vadd.f32 %v990_v47, %v989_v49 }
 0x86b   :  { %v992_v15 = vrot.slane %v991_v48, 4 }
 0x86d   :  { %v993_v55 = vadd.f32 %v992_v15, %v991_v48 }
 0x86f   :  { %v994_v16 = vrot.slane %v993_v55, 2 }
 0x871   :  { %v995_v56 = vadd.f32 %v994_v16, %v993_v55 }
 0x873   :  { %v996_v57 = vrot.slane %v995_v56, 1 }
 0x875   :  { %v997_v20 = vadd.f32 %v996_v57, %v995_v56 }
 0x877   :  { %v998_v0 = vmul.f32 0.0625, %v997_v20 }
 0x879   :  { %v999_v21 = vmul.f32 %v998_v0, %v1736_v36 }
 0x87b   :  { %v1003_v1 = vrot.slane %v999_v21, %v1630_v32 }
 0x87d   :  { %v1004_v22 = vsub.f32 %v981_v12, %v1003_v1  ;;  %v1005_v59 = vsub.f32 %v986_v41, %v1003_v1 }
 0x87f   :  { %v1006_v23 = vmul.f32 %v1004_v22, %v1004_v22  ;;  %v1007_v3 = vmul.f32 %v1005_v59, %v1005_v59 }
 0x881   :  { %v1008_v25 = vsel %vm140_vm0, %v1006_v23, 0.0  ;;  %v1009_v9 = vsel %vm140_vm0, %v1007_v3, 0.0 }
 0x882   :  { %v1010_v28 = vadd.f32 %v1009_v9, %v1008_v25 }
 0x884   :  { %v1011_v10 = vrot.slane %v1010_v28, 4 }
 0x886   :  { %v1012_v29 = vadd.f32 %v1011_v10, %v1010_v28 }
 0x888   :  { %v1013_v17 = vrot.slane %v1012_v29, 2 }
 0x88a   :  { %v1014_v30 = vadd.f32 %v1013_v17, %v1012_v29 }
 0x88c   :  { %v1015_v37 = vrot.slane %v1014_v30, 1 }
 0x88e   :  { %v1016_v42 = vadd.f32 %v1015_v37, %v1014_v30 }
 0x890   :  { %v1017_v19 = vmul.f32 0.0625, %v1016_v42 }
 0x892   :  { %v1018_v43 = vadd.f32 1e-05, %v1017_v19 }
 0x894   :  { %1258 = vrsqrt.f32 %v1018_v43 }
 0x89e   :  { %v1259_v36 = vpop.eup %1258 }
 0x89f   :  { %v1020_v31 = vmul.f32 %v1259_v36, %v1745_v6 }
 0x8a1   :  { %v1025_v18 = vrot.slane %v1020_v31, %v1630_v32 }
 0x8a3   :  { %v1027_v44 = vmul.f32 %v1025_v18, %v1004_v22  ;;  %v1028_v26 = vmul.f32 %v1025_v18, %v1005_v59 }
 0x8a5   :  { %v1029_v27 = vadd.f32 %v1752_v14, %v1027_v44  ;;  %v1030_v45 = vadd.f32 %v1752_v14, %v1028_v26 }
 0x8a7   :  { %v1031_v46 = vadd.f32 %v1029_v27, %v1595_v8  ;;  %v1032_v50 = vadd.f32 %v1030_v45, %v1599_v13 }
 0x8a9   :  { %vm1033_vm12 = vcmp.gt.f32.partialorder %v1031_v46, 0.0  ;;  %vm1034_vm13 = vcmp.gt.f32.partialorder %v1032_v50, 0.0  ;;  %v1035_v51 = vmul.f32 0.01, %v1031_v46  ;;  %v1036_v34 = vmul.f32 0.01, %v1032_v50 }
 0x8ab   :  { %v1037_v6 = vsel %vm1033_vm12, %v1031_v46, %v1035_v51  ;;  %v1038_v54 = vsel %vm1034_vm13, %v1032_v50, %v1036_v34 }
 0x8ac   :  { %1039 = vst.msk [vmem:[#allocation11] sm:$0xff] %vm140_vm0, %v1037_v6  ;;  %1040 = vst.msk [vmem:[#allocation11 + $0x8] sm:$0xff] %vm140_vm0, %v1038_v54 }
 0x8ad   :  { %1381 = shalt.err (!%p1378_p2)
}
 0x8ae   :  { %s1879_s29 = sld [smem:[#allocation20_spill]] }
 0x8b4   :  { %s1382_s22 = scalar_lea.hbm %s1879_s29, 256 }
 0x8b5   :  { %p1383_p3 = scmp.ne.s32.totalorder %s1879_s29, %s1382_s22  ;;  %p1386_p4 = scmp.lt.u32.totalorder %s1382_s22, %s1879_s29 }
 0x8b7   :  { %p1388_p5 = pnand %p1386_p4, %p1383_p3 }
 0x8b9   :  { %1391 = shalt.err (!%p1388_p5)
}
 0x8ba   :  { %1052 = dma.vmem_to_hbm [thread:$0]  %s1047_s14, 256, %s1879_s29, [#allocation4], %s1402_s25, %s1402_s25, %s1403_s26  }
 0x8bb   :  { %1398 = dma.done.wait [#allocation4], 256  }
 0x8bc   :  { %1399 = vsyncadd [#allocation4], 4294967040 }
 0x8bd   :  { %1056 = vsyncpa [#allocation3], 1 }
 0x8be   :  { %1057 = vsyncpa [#allocation6], 1 }
 0x8bf   :  { %1058 = vsyncpa [#allocation9], 1 }
 0x8c0   :  { %1059 = vsyncpa [#allocation4], 1 }

</bundles_post_ra>
